<compile_context>
chip_gen: v6e
topology: v6e:2x2x1
jax: 0.10.0
libtpu: 0.0.40
codegen_flags: <defaults>
</compile_context>

<pallas_src>
import functools

import jax
import jax.numpy as jnp
from jax.experimental import pallas as pl
from jax.experimental.pallas import tpu as pltpu


def _round_up(v, m):
    return ((v + m - 1) // m) * m


def _vmem_cap_bytes():
    """Per-core VMEM capacity; conservative fallback if the query fails."""
    try:
        return int(pltpu.get_tpu_info().vmem_capacity_bytes)
    except Exception:
        return 64 << 20          # v7x per-TensorCore size (the smallest)


def _pick_hid_tile(in_p, hid_p, out_p, max_weight_bytes):
    """Largest hid tile (multiple of 128, divides hid_p) fitting the budget."""
    full = (in_p + out_p + 2) * hid_p * 2          # bf16 weights + biases
    if full <= max_weight_bytes:
        return hid_p
    # When tiled, the weight operands are double-buffered -> factor of 2.
    per_tile_128 = (in_p + out_p + 2) * 128 * 2 * 2
    n128 = max(1, max_weight_bytes // per_tile_128)
    hid_tile = min(hid_p, n128 * 128)
    while hid_p % hid_tile:
        hid_tile -= 128
    return max(128, hid_tile)


# ---------------------------------------------------------------------------
# Kernels
# ---------------------------------------------------------------------------
def _mlp_kernel_small(x_ref, w1_ref, b1_ref, w2_ref, b2_ref, o_ref):
    """Single-step kernel for tiny feature dims (no padding, full blocks)."""
    h = jnp.dot(x_ref[...], w1_ref[...], preferred_element_type=jnp.float32)
    h = jnp.maximum(h + b1_ref[...], 0.0)
    y = jnp.dot(h.astype(jnp.bfloat16), w2_ref[...],
                preferred_element_type=jnp.float32)
    o_ref[...] = (y + b2_ref[...]).astype(o_ref.dtype)


def _mlp_kernel_tiled(x_ref, w1_ref, b1_ref, w2_ref, b2_ref, o_ref, acc_ref):
    """General kernel: rows on grid axis 0 (parallel), hid on axis 1 (arbitrary)."""
    k = pl.program_id(1)

    @pl.when(k == 0)
    def _init():
        acc_ref[...] = jnp.zeros_like(acc_ref)

    # First linear on this hid slice (bf16 MXU, f32 accumulation) + bias + ReLU.
    h = jnp.dot(x_ref[...], w1_ref[...], preferred_element_type=jnp.float32)
    h = jnp.maximum(h + b1_ref[...], 0.0)
    # Second linear: this hid slice's contribution, accumulated in f32.
    acc_ref[...] += jnp.dot(h.astype(jnp.bfloat16), w2_ref[...],
                            preferred_element_type=jnp.float32)

    @pl.when(k == pl.num_programs(1) - 1)
    def _finalize():
        o_ref[...] = (acc_ref[...] + b2_ref[...]).astype(o_ref.dtype)


# ---------------------------------------------------------------------------
# Forward wrappers
# ---------------------------------------------------------------------------
@jax.jit
def _mlp_forward_small(x, w1, b1, w2, b2):
    B, in_dim = x.shape
    hid_dim = w1.shape[1]
    out_dim = w2.shape[1]
    xb = x.astype(jnp.bfloat16)
    return pl.pallas_call(
        _mlp_kernel_small,
        out_shape=jax.ShapeDtypeStruct((B, out_dim), x.dtype),
        grid_spec=pltpu.PrefetchScalarGridSpec(
            num_scalar_prefetch=0,
            grid=(1,),
            in_specs=[
                pl.BlockSpec((B, in_dim), lambda i: (0, 0)),
                pl.BlockSpec((in_dim, hid_dim), lambda i: (0, 0)),
                pl.BlockSpec((1, hid_dim), lambda i: (0, 0)),
                pl.BlockSpec((hid_dim, out_dim), lambda i: (0, 0)),
                pl.BlockSpec((1, out_dim), lambda i: (0, 0)),
            ],
            out_specs=pl.BlockSpec((B, out_dim), lambda i: (0, 0)),
        ),
        compiler_params=pltpu.CompilerParams(
            dimension_semantics=("arbitrary",),
        ),
    )(xb, w1, b1, w2, b2)


@functools.partial(
    jax.jit,
    static_argnames=("out_dim", "block_rows_req", "max_weight_vmem_bytes"))
def _mlp_forward_padded(x, w1b, b1f, w2b, b2f, *, out_dim, block_rows_req,
                        max_weight_vmem_bytes):
    B, in_dim = x.shape
    in_p, hid_p = w1b.shape
    out_p = w2b.shape[1]
    out_dtype = x.dtype
    itemsize = jnp.dtype(out_dtype).itemsize

    cap = _vmem_cap_bytes()

    # ---- row tiling: single block for small batches, 128-multiples otherwise.
    if B <= 256:
        block_rows = _round_up(max(B, 8), 16)
    else:
        block_rows = min(_round_up(block_rows_req, 128), 512)
    n_blocks = pl.cdiv(B, block_rows)          # no forced >= 2 steps
    B_p = n_blocks * block_rows

    # ---- hidden tiling: keep resident weights under the VMEM budget.
    budget = (min(cap, 128 << 20) // 3 if max_weight_vmem_bytes is None
              else int(max_weight_vmem_bytes))
    hid_tile = _pick_hid_tile(in_p, hid_p, out_p, budget)
    n_hid = hid_p // hid_tile

    # ---- pad + cast the activations only (weights were prepared once).
    xb = x.astype(jnp.bfloat16)
    if B_p != B or in_p != in_dim:
        xb = jnp.pad(xb, ((0, B_p - B), (0, in_p - in_dim)))

    # ---- VMEM budget (clamped to the actual chip) + cost estimate.
    w_bufs = 1 if n_hid == 1 else 2
    need = (2 * block_rows * in_p * 2
            + 2 * block_rows * out_p * itemsize
            + w_bufs * (in_p * hid_tile * 2 + hid_tile * out_p * 2
                        + hid_tile * 4)
            + out_p * 4
            + block_rows * out_p * 4           # f32 accumulator scratch
            + block_rows * hid_tile * 4)       # f32 hidden intermediate
    vmem_limit = int(min(max(2 * need, 32 << 20), cap - (8 << 20)))

    flops = 2 * B_p * in_p * hid_p + 2 * B_p * hid_p * out_p
    bytes_accessed = (B_p * in_p * 2 + in_p * hid_p * 2 + hid_p * out_p * 2
                      + hid_p * 4 + out_p * 4 + B_p * out_p * itemsize)
    cost = pl.CostEstimate(flops=flops, transcendentals=0,
                           bytes_accessed=bytes_accessed)

    # Operands whose index_map is constant over the whole grid are resident:
    # single-buffer them. Hid-tiled operands keep default double-buffering.
    resident = pl.Buffered(1)
    w_mode = resident if n_hid == 1 else None

    def _spec(shape, index_map, mode):
        if mode is None:
            return pl.BlockSpec(shape, index_map)
        return pl.BlockSpec(shape, index_map, pipeline_mode=mode)

    out = pl.pallas_call(
        _mlp_kernel_tiled,
        out_shape=jax.ShapeDtypeStruct((B_p, out_p), out_dtype),
        grid_spec=pltpu.PrefetchScalarGridSpec(
            num_scalar_prefetch=0,
            grid=(n_blocks, n_hid),            # reduction (hid) axis last
            in_specs=[
                pl.BlockSpec((block_rows, in_p), lambda i, k: (i, 0)),
                _spec((in_p, hid_tile), lambda i, k: (0, k), w_mode),
                _spec((1, hid_tile), lambda i, k: (0, k), w_mode),
                _spec((hid_tile, out_p), lambda i, k: (k, 0), w_mode),
                _spec((1, out_p), lambda i, k: (0, 0), resident),
            ],
            out_specs=pl.BlockSpec((block_rows, out_p), lambda i, k: (i, 0)),
            scratch_shapes=[pltpu.VMEM((block_rows, out_p), jnp.float32)],
        ),
        compiler_params=pltpu.CompilerParams(
            dimension_semantics=("parallel", "arbitrary"),
            vmem_limit_bytes=vmem_limit,
        ),
        cost_estimate=cost,
    )(xb, w1b, b1f, w2b, b2f)

    if B_p != B or out_p != out_dim:
        out = out[:B, :out_dim]
    return out


def make_mlp_forward(w1, b1, w2, b2, *, block_rows=256,
                     max_weight_vmem_bytes=None):
    """Pads/casts the MLP parameters ONCE and returns `fwd(x)`.

    y = relu(x @ w1 + b1) @ w2 + b2
    w1: [in_dim, hid_dim]   (pre-transposed vs. torch Linear's [out, in])
    b1: [hid_dim], w2: [hid_dim, out_dim], b2: [out_dim]
    """
    w1 = jnp.asarray(w1)
    w2 = jnp.asarray(w2)
    b1 = jnp.asarray(b1).reshape(-1)
    b2 = jnp.asarray(b2).reshape(-1)
    in_dim, hid_dim = w1.shape
    out_dim = w2.shape[1]

    # Tiny feature dims: full-array blocks are legal, so skip the 128-lane
    # padding entirely (the padded machinery would do 8-32x redundant work).
    if max(in_dim, hid_dim, out_dim) <= 128:
        w1c = w1.astype(jnp.bfloat16)
        w2c = w2.astype(jnp.bfloat16)
        b1c = b1.astype(jnp.float32).reshape(1, -1)
        b2c = b2.astype(jnp.float32).reshape(1, -1)
        return lambda x: _mlp_forward_small(x, w1c, b1c, w2c, b2c)

    # General path: lane-dense 128-padded parameters, prepared once.
    in_p, hid_p, out_p = (_round_up(d, 128) for d in (in_dim, hid_dim, out_dim))
    w1b = jnp.zeros((in_p, hid_p), jnp.bfloat16).at[:in_dim, :hid_dim].set(
        w1.astype(jnp.bfloat16))
    w2b = jnp.zeros((hid_p, out_p), jnp.bfloat16).at[:hid_dim, :out_dim].set(
        w2.astype(jnp.bfloat16))
    b1f = jnp.zeros((1, hid_p), jnp.float32).at[0, :hid_dim].set(
        b1.astype(jnp.float32))
    b2f = jnp.zeros((1, out_p), jnp.float32).at[0, :out_dim].set(
        b2.astype(jnp.float32))
    return lambda x: _mlp_forward_padded(
        x, w1b, b1f, w2b, b2f, out_dim=out_dim, block_rows_req=block_rows,
        max_weight_vmem_bytes=max_weight_vmem_bytes)


def mlp_reference(x, w1, b1, w2, b2):
    """Reference matching the kernel's bf16-operand / f32-accumulate path."""
    # TODO(synk): if exact f32 PyTorch parity is required, switch the kernel
    # matmuls to f32 operands (slower on the MXU) instead of bf16.
    xf = x.astype(jnp.bfloat16).astype(jnp.float32)
    w1f = w1.astype(jnp.bfloat16).astype(jnp.float32)
    w2f = w2.astype(jnp.bfloat16).astype(jnp.float32)
    h = jnp.maximum(xf @ w1f + b1.reshape(1, -1).astype(jnp.float32), 0.0)
    h = h.astype(jnp.bfloat16).astype(jnp.float32)
    return h @ w2f + b2.reshape(1, -1).astype(jnp.float32)


# ---------------------------------------------------------------------------
# Demo / self-test
# ---------------------------------------------------------------------------
if __name__ == "__main__":
    def make_params(key, in_dim, out_dim):
        kw1, kb1, kw2, kb2 = jax.random.split(key, 4)
        bound1 = 1.0 / (in_dim ** 0.5)
        w1 = jax.random.uniform(kw1, (in_dim, out_dim), jnp.float32, -bound1, bound1)
        b1 = jax.random.uniform(kb1, (out_dim,), jnp.float32, -bound1, bound1)
        bound2 = 1.0 / (out_dim ** 0.5)
        w2 = jax.random.uniform(kw2, (out_dim, out_dim), jnp.float32, -bound2, bound2)
        b2 = jax.random.uniform(kb2, (out_dim,), jnp.float32, -bound2, bound2)
        return w1, b1, w2, b2

    key = jax.random.PRNGKey(0)
    k1, k2, k3, kx1, kx2, kx3 = jax.random.split(key, 6)

    # 1) Tiny shapes matching the module: MLP(in_dim=16, out_dim=32), batch=8.
    B, in_dim, out_dim = 8, 16, 32
    params = make_params(k1, in_dim, out_dim)
    x = jax.random.normal(kx1, (B, in_dim), jnp.float32)
    out = jax.block_until_ready(make_mlp_forward(*params)(x))
    ref = mlp_reference(x, *params)
    assert out.shape == (B, out_dim), out.shape
    assert jnp.allclose(out, ref, atol=2e-2, rtol=2e-2), "small-path mismatch"

    # 2) General padded path: resident (single-buffered) weights, 2 row blocks.
    B, in_dim, out_dim = 384, 192, 160
    params = make_params(k2, in_dim, out_dim)
    x = jax.random.normal(kx2, (B, in_dim), jnp.float32)
    out = jax.block_until_ready(make_mlp_forward(*params)(x))
    ref = mlp_reference(x, *params)
    assert out.shape == (B, out_dim), out.shape
    assert jnp.allclose(out, ref, atol=2e-2, rtol=2e-2), "padded-path mismatch"

    # 3) Hidden-dim-tiled path (small forced weight budget to exercise the
    #    pl.when-initialized accumulator, as used for wide MLPs on v7x).
    B, in_dim, out_dim = 128, 256, 512
    params = make_params(k3, in_dim, out_dim)
    x = jax.random.normal(kx3, (B, in_dim), jnp.float32)
    out = jax.block_until_ready(
        make_mlp_forward(*params, max_weight_vmem_bytes=512 * 1024)(x))
    ref = mlp_reference(x, *params)
    assert out.shape == (B, out_dim), out.shape
    assert jnp.allclose(out, ref, atol=2e-2, rtol=2e-2), "hid-tiled mismatch"

    print("KERNEL_OK")
</pallas_src>

<mosaic_0001>
module attributes {stable_mosaic.version = 11 : i64} {
  func.func @_mlp_kernel_small(%arg0: i32, %arg1: memref<8x16xbf16, #tpu.memory_space<vmem>>, %arg2: memref<16x32xbf16, #tpu.memory_space<vmem>>, %arg3: memref<1x32xf32, #tpu.memory_space<vmem>>, %arg4: memref<32x32xbf16, #tpu.memory_space<vmem>>, %arg5: memref<1x32xf32, #tpu.memory_space<vmem>>, %arg6: memref<8x32xf32, #tpu.memory_space<vmem>>) attributes {dimension_semantics = [#tpu.dimension_semantics<arbitrary>], iteration_bounds = array<i64: 1>, scalar_prefetch = 0 : i64, scratch_operands = 0 : i64, tpu.core_type = #tpu.core_type<tc>, window_params = [{pipeline_mode = #tpu.pipeline_mode<synchronous>, transform_indices = @transform_0, window_bounds = array<i64: 8, 16>}, {pipeline_mode = #tpu.pipeline_mode<synchronous>, transform_indices = @transform_1, window_bounds = array<i64: 16, 32>}, {pipeline_mode = #tpu.pipeline_mode<synchronous>, transform_indices = @transform_2, window_bounds = array<i64: 1, 32>}, {pipeline_mode = #tpu.pipeline_mode<synchronous>, transform_indices = @transform_3, window_bounds = array<i64: 32, 32>}, {pipeline_mode = #tpu.pipeline_mode<synchronous>, transform_indices = @transform_4, window_bounds = array<i64: 1, 32>}, {pipeline_mode = #tpu.pipeline_mode<synchronous>, transform_indices = @transform_5, window_bounds = array<i64: 8, 32>}]} {
    %c0 = arith.constant 0 : index
    %c0_0 = arith.constant 0 : index
    %0 = vector.load %arg1[%c0, %c0_0] : memref<8x16xbf16, #tpu.memory_space<vmem>>, vector<8x16xbf16>
    %c0_1 = arith.constant 0 : index
    %c0_2 = arith.constant 0 : index
    %1 = vector.load %arg2[%c0_1, %c0_2] : memref<16x32xbf16, #tpu.memory_space<vmem>>, vector<16x32xbf16>
    %cst = arith.constant dense<0.000000e+00> : vector<8x32xf32>
    %2 = tpu.matmul %0, %1, %cst {dimension_numbers = #tpu.dot_dimension_numbers<[1], [0], [0], [1], [0, 0, 1, 1], [], []>} : vector<8x16xbf16>, vector<16x32xbf16>, vector<8x32xf32> -> vector<8x32xf32>
    %c0_3 = arith.constant 0 : index
    %c0_4 = arith.constant 0 : index
    %3 = vector.load %arg3[%c0_3, %c0_4] : memref<1x32xf32, #tpu.memory_space<vmem>>, vector<1x32xf32>
    %4 = vector.broadcast %3 : vector<1x32xf32> to vector<8x32xf32>
    %5 = arith.addf %2, %4 : vector<8x32xf32>
    %cst_5 = arith.constant 0.000000e+00 : f32
    %6 = vector.broadcast %cst_5 : f32 to vector<8x32xf32>
    %7 = arith.maximumf %5, %6 : vector<8x32xf32>
    %8 = arith.truncf %7 : vector<8x32xf32> to vector<8x32xbf16>
    %c0_6 = arith.constant 0 : index
    %c0_7 = arith.constant 0 : index
    %9 = vector.load %arg4[%c0_6, %c0_7] : memref<32x32xbf16, #tpu.memory_space<vmem>>, vector<32x32xbf16>
    %cst_8 = arith.constant dense<0.000000e+00> : vector<8x32xf32>
    %10 = tpu.matmul %8, %9, %cst_8 {dimension_numbers = #tpu.dot_dimension_numbers<[1], [0], [0], [1], [0, 0, 1, 1], [], []>} : vector<8x32xbf16>, vector<32x32xbf16>, vector<8x32xf32> -> vector<8x32xf32>
    %c0_9 = arith.constant 0 : index
    %c0_10 = arith.constant 0 : index
    %11 = vector.load %arg5[%c0_9, %c0_10] : memref<1x32xf32, #tpu.memory_space<vmem>>, vector<1x32xf32>
    %12 = vector.broadcast %11 : vector<1x32xf32> to vector<8x32xf32>
    %13 = arith.addf %10, %12 : vector<8x32xf32>
    %c0_11 = arith.constant 0 : index
    %c0_12 = arith.constant 0 : index
    %14 = vector.load %arg6[%c0_11, %c0_12] : memref<8x32xf32, #tpu.memory_space<vmem>>, vector<8x32xf32>
    tpu.vector_store %arg6[%c0_11, %c0_12], %13 {strides = array<i32>} : memref<8x32xf32, #tpu.memory_space<vmem>>, vector<8x32xf32>,
    return
  }
  func.func @transform_0(%arg0: i32) -> (i32, i32) {
    %c0_i32 = arith.constant 0 : i32
    %c0_i32_0 = arith.constant 0 : i32
    %c0_i32_1 = arith.constant 0 : i32
    return %c0_i32, %c0_i32_0 : i32, i32
  }
  func.func @transform_1(%arg0: i32) -> (i32, i32) {
    %c0_i32 = arith.constant 0 : i32
    %c0_i32_0 = arith.constant 0 : i32
    %c0_i32_1 = arith.constant 0 : i32
    return %c0_i32, %c0_i32_0 : i32, i32
  }
  func.func @transform_2(%arg0: i32) -> (i32, i32) {
    %c0_i32 = arith.constant 0 : i32
    %c0_i32_0 = arith.constant 0 : i32
    %c0_i32_1 = arith.constant 0 : i32
    return %c0_i32, %c0_i32_0 : i32, i32
  }
  func.func @transform_3(%arg0: i32) -> (i32, i32) {
    %c0_i32 = arith.constant 0 : i32
    %c0_i32_0 = arith.constant 0 : i32
    %c0_i32_1 = arith.constant 0 : i32
    return %c0_i32, %c0_i32_0 : i32, i32
  }
  func.func @transform_4(%arg0: i32) -> (i32, i32) {
    %c0_i32 = arith.constant 0 : i32
    %c0_i32_0 = arith.constant 0 : i32
    %c0_i32_1 = arith.constant 0 : i32
    return %c0_i32, %c0_i32_0 : i32, i32
  }
  func.func @transform_5(%arg0: i32) -> (i32, i32) {
    %c0_i32 = arith.constant 0 : i32
    %c0_i32_0 = arith.constant 0 : i32
    %c0_i32_1 = arith.constant 0 : i32
    return %c0_i32, %c0_i32_0 : i32, i32
  }
}

</mosaic_0001>

<bundles_post_ra>
// kernel: _mlp_forward_small.1
= control target key start
LH: loop header
LB: loop body
LE: loop exit
PB: predicated region body
PF: predicated region fallthrough
CT: control target
= control target key end

     0   :  { %10 = vsyncpa [#allocation3], 0  ;;  %s317_s0 = inlined_call_operand.vmem [shape: bf16[8,16], index: 0, kind: input, shape index: {}]   ;;  %s318_s1 = inlined_call_operand.hbm [shape: bf16[16,32], index: 1, kind: input, shape index: {}]   ;;  %s319_s2 = inlined_call_operand.vmem [shape: f32[1,32], index: 2, kind: input, shape index: {}]   ;;  %s320_s3 = inlined_call_operand.vmem [shape: bf16[32,32], index: 3, kind: input, shape index: {}]   ;;  %s321_s4 = inlined_call_operand.vmem [shape: f32[1,32], index: 4, kind: input, shape index: {}]   ;;  %s322_s5 = inlined_call_operand.hbm [shape: f32[8,32], index: 5, kind: output, shape index: {}]  }
   0x1   :  { %11 = vsyncpa [#allocation4], 0  ;;  %s260_s18 = smov [#allocation2]  }
   0x2   :  { %s19_s19 = sshll.u32 %s260_s18, 4  ;;  %s20_s19 = int_to_ptr.vmem [resolvable:$true] %s19_s19 }
   0x3   :  { %s224_s20 = scalar_lea.vmem %s20_s19, 128  ;;  %p229_p1 = scmp.lt.s32.totalorder %s20_s19, %s20_s19 }
   0x4   :  { %p225_p0 = scmp.ne.s32.totalorder %s20_s19, %s224_s20  ;;  %p230_p2 = scmp.lt.s32.totalorder %s224_s20, %s224_s20 }
   0x6   :  { %p231_p3 = por %p230_p2, %p229_p1 }
   0x8   :  { %p232_p4 = pnand %p231_p3, %p225_p0 }
   0xa   :  { %235 = shalt.err (!%p232_p4)
}
   0xb   :  { %s261_s21 = smov 64   ;;  %s262_s22 = smov 4  }
   0xc   :  { %25 = dma.hbm_to_vmem [thread:$0]  %s318_s1, 128, %s20_s19, [#allocation3], %s261_s21, %s261_s21, %s262_s22  }
   0xd   :  { %256 = dma.done.wait [#allocation3], 128  }
   0xe   :  { %257 = vsyncadd [#allocation3], 4294967168  ;;  %v263_v0 = vmov 0.0   ;;  %vm264_vm0 = vmmov 0   ;;  %v213_v1 = vld [vmem:[#allocation2] sm:$0xff]   ;;  %vm52_vm1 = vcmask 130048  }
   0xf   :  { %193 = vmatprep.subr.bf16.mxu0 %v263_v0  ;;  %195 = vmatprep.mubr.msk.bf16.mxu0 %vm264_vm0, %v263_v0  ;;  %v36_v2 = vld [vmem:[%s317_s0] sm:$0xf]  ;;  %v214_v3 = vld [vmem:[%s320_s3 + $0x8] sm:$0xff]   ;;  %vm121_vm2 = vcmask 261120   ;;  %s265_s8 = smov [#allocation5]  }
  0x10   :  { %199 = vmatprep.subr.bf16.mxu1 %v263_v0  ;;  %203 = vmatprep.mubr.msk.bf16.mxu1 %vm264_vm0, %v263_v0  ;;  %v215_v4 = vld [vmem:[%s320_s3] sm:$0xff]   ;;  %s172_s3 = sshll.u32 %s265_s8, 4  ;;  %s173_s3 = int_to_ptr.vmem [resolvable:$true] %s172_s3 }
  0x11   :  { %194 = vmatpush3.bf16.msra.mxu0 %v213_v1  ;;  %200 = vmatpush3.bf16.msra.mxu1 %v214_v3  ;;  %v181_v5 = vld [vmem:[%s319_s2] ss:$0 sm:$0xff]  ;;  %s236_s2 = scalar_lea.vmem %s173_s3, 128  ;;  %p241_p6 = scmp.lt.s32.totalorder %s173_s3, %s173_s3 }
  0x12   :  { %201 = vmatprep.subr.bf16.mxu1 %v263_v0  ;;  %v184_v13 = vld [vmem:[%s321_s4] ss:$0 sm:$0xff]  ;;  %p237_p5 = scmp.ne.s32.totalorder %s173_s3, %s236_s2  ;;  %p242_p7 = scmp.lt.s32.totalorder %s236_s2, %s236_s2 }
  0x14   :  { %196 = vmatmul.mubr.msk.bf16.vlgmr.msra.gmra.mxu0 %vm52_vm1, %v36_v2  ;;  %p243_p8 = por %p242_p7, %p241_p6 }
  0x15   :  { %202 = vmatpush3.bf16.msra.mxu1 %v215_v4 }
  0x16   :  { %p244_p9 = pnand %p243_p8, %p237_p5 }
  0xd4   :  { %v90_v6 = vpop.f32.mrf.mxu0 }
  0xd5   :  { %v91_v7 = vadd.f32 %v181_v5, %v90_v6 }
  0xd6   :  { %v197_v8 = vpop.f32.mrf.mxu0 }
  0xd7   :  { %v96_v9 = vmax.f32 %v91_v7, 0.0 }
  0xd8   :  { %v93_v10 = vpop.f32.mrf.mxu0 }
  0xd9   :  { %v97_v11 = vpack.c.bf16 %v96_v9, %v96_v9 }
  0xda   :  { %v198_v12 = vpop.f32.mrf.mxu0 }
  0xdb   :  { %204 = vmatmul.mubr.msk.bf16.vlgmr.msra.gmra.mxu1 %vm121_vm2, %v97_v11 }
 0x19b   :  { %v159_v14 = vpop.f32.mrf.mxu1 }
 0x19c   :  { %v160_v15 = vadd.f32 %v184_v13, %v159_v14 }
 0x19d   :  { %v205_v16 = vpop.f32.mrf.mxu1 }
 0x19e   :  { %165 = vst.msk [vmem:[#allocation5] sm:$0xff] %vm121_vm2, %v160_v15 }
 0x19f   :  { %v162_v17 = vpop.f32.mrf.mxu1 }
 0x1a0   :  { %247 = shalt.err (!%p244_p9)
}
 0x1a1   :  { %175 = dma.vmem_to_hbm [thread:$0]  %s173_s3, 128, %s322_s5, [#allocation4]   ;;  %v206_v18 = vpop.f32.mrf.mxu1 }
 0x1a2   :  { %258 = dma.done.wait [#allocation4], 128  }
 0x1a3   :  { %259 = vsyncadd [#allocation4], 4294967168 }
 0x1a4   :  { %179 = vsyncpa [#allocation3], 1 }
 0x1a5   :  { %180 = vsyncpa [#allocation4], 1 }

</bundles_post_ra>
